<compile_context>
chip_gen: v7x
topology: tpu7x:2x2x1
jax: 0.10.0
libtpu: 0.0.40
codegen_flags: <defaults>
</compile_context>

<pallas_src>
import math

import jax
import jax.numpy as jnp
from jax.experimental import pallas as pl
from jax.experimental.pallas import tpu as pltpu  # noqa: F401  (TPU backend)


def _round_up(x, m):
    return ((x + m - 1) // m) * m


# --------------------------------------------------------------------------- #
# Kernels
# --------------------------------------------------------------------------- #
def latent_attention_kernel(meta_ref, main_ref, w_ctx_ref, w_qry_ref, tail_ref, z_ref):
    BS = meta_ref.shape[0]              # batch * src_len
    B = main_ref.shape[0]               # batch
    S = BS // B                         # src_len
    DQP = w_ctx_ref.shape[1] // 2       # q_dim padded to a multiple of 128
    Dz = z_ref.shape[1]                 # z_dim (unpadded output width)

    # --- MXU: one fused dot for BOTH context projections (same LHS); 128-aligned split
    su = jnp.dot(meta_ref[...], w_ctx_ref[...], preferred_element_type=jnp.float32)
    s_proj = su[:, :DQP].reshape(B, S, DQP)     # projected memory bank (padded lanes = 0)
    uh     = su[:, DQP:].reshape(B, S, DQP)     # GlobalAttention context features

    # --- MXU: one fused dot for BOTH query projections; GA query bias folded via the
    #     ones column appended to main_output_t in the wrapper.
    qw = jnp.dot(main_ref[...], w_qry_ref[...], preferred_element_type=jnp.float32)
    q_proj = qw[:, :DQP]                        # (B, DQP)
    wq     = qw[:, DQP:]                        # (B, DQP), already includes b_q

    # --- MLP attention score (tanh on EUP, lane reduce on XLU); padded lanes contribute 0
    v = tail_ref[0:1, :DQP].reshape(1, 1, DQP)
    wquh = jnp.tanh(wq[:, None, :] + uh)                      # (B, S, DQP)
    align = jnp.sum(wquh * v, axis=-1)                        # (B, S)

    # --- softmax over source positions; normalization folded into the context step,
    #     reciprocal on the otherwise-idle EUP slot instead of a VPU divide.
    m = jnp.max(align, axis=-1, keepdims=True)
    e = jnp.exp(align - m)
    denom = jnp.sum(e, axis=-1, keepdims=True)                # (B, 1)
    c_un = jnp.sum(e[:, :, None] * s_proj, axis=1)            # (B, DQP) unnormalized context
    c = c_un * pl.reciprocal(denom, approx=True)              # (B, DQP)

    # --- composed output head: z = c @ Woz_c + q @ Woz_q + b_oz  (Woz = W_out^T @ W_z^T)
    #     all sublane slice offsets (8, 8+DQP, 8+2*DQP) are multiples of 8.
    w_oz_c = tail_ref[8:8 + DQP, :]
    w_oz_q = tail_ref[8 + DQP:8 + 2 * DQP, :]
    b_oz   = tail_ref[8 + 2 * DQP:9 + 2 * DQP, :]
    z = (jnp.dot(c,      w_oz_c, preferred_element_type=jnp.float32)
         + jnp.dot(q_proj, w_oz_q, preferred_element_type=jnp.float32)
         + b_oz)                                              # (B, TL), extra lanes are zero
    z_ref[...] = z[:, :Dz].astype(z_ref.dtype)


def linear_kernel(x_ref, w_ref, b_ref, o_ref):
    """use_attention=False path: z = W_z(meta_outputs[:, -1, :])."""
    o_ref[...] = (jnp.dot(x_ref[...], w_ref[...], preferred_element_type=jnp.float32)
                  + b_ref[...]).astype(o_ref.dtype)


# --------------------------------------------------------------------------- #
# Wrappers
# --------------------------------------------------------------------------- #
def _full_spec(shape):
    """Full-array VMEM block for a grid-less call (rank bound explicitly)."""
    nd = len(shape)
    return pl.BlockSpec(shape, lambda *_, _nd=nd: (0,) * _nd)


def latent_layer_attention(meta_outputs, main_output_t, packed):
    B, S, Dm = meta_outputs.shape
    Dq = main_output_t.shape[-1]
    Dz = packed["z_dim"]
    DQP = packed["w_ctx"].shape[1] // 2
    TL = packed["tail"].shape[1]

    # Relayout-free in-kernel reshape (B*S, DQP) -> (B, S, DQP) wants S % 8 == 0.
    assert S % 8 == 0, "pad src_len to a multiple of 8 before calling the kernel"

    # Wrapper-side layout plumbing (free): flatten the memory bank, append the ones
    # column that folds the GlobalAttention query bias into the packed weight slab.
    meta2d = meta_outputs.reshape(B * S, Dm)
    main_aug = jnp.concatenate(
        [main_output_t, jnp.ones((B, 1), main_output_t.dtype)], axis=-1)   # (B, Dq+1)

    operands = (meta2d, main_aug, packed["w_ctx"], packed["w_qry_aug"], packed["tail"])

    flops = (2 * B * S * Dm * (2 * DQP)        # fused context projections
             + 2 * B * (Dq + 1) * (2 * DQP)    # fused query projections (+bias fold)
             + 4 * B * S * DQP                 # score dot + context vector
             + 4 * B * DQP * TL)               # composed output head (two dots)
    transcendentals = B * S * DQP + B * S + B  # tanh + exp + reciprocal
    bytes_accessed = int(sum(int(x.size) * x.dtype.itemsize for x in operands)
                         + B * Dz * 4)

    # NOTE(v7x): grid=() pins the call to one TensorCore; if many independent steps are
    # evaluated per call, add a leading "parallel" grid axis over them to use both TCs.
    return pl.pallas_call(
        latent_attention_kernel,
        out_shape=jax.ShapeDtypeStruct((B, Dz), main_output_t.dtype),
        grid=(),
        in_specs=[_full_spec(op.shape) for op in operands],
        out_specs=_full_spec((B, Dz)),
        cost_estimate=pl.CostEstimate(flops=int(flops),
                                      transcendentals=int(transcendentals),
                                      bytes_accessed=bytes_accessed),
    )(*operands)


def latent_layer_no_attention(meta_outputs, packed_noattn):
    x = meta_outputs[:, -1, :]                 # last timestep (wrapper-side slice)
    w = packed_noattn["w"]                     # (meta_dim, z_dim), pre-transposed
    b = packed_noattn["b"]                     # (1, z_dim)
    B = x.shape[0]
    Dz = w.shape[-1]
    operands = (x, w, b)
    return pl.pallas_call(
        linear_kernel,
        out_shape=jax.ShapeDtypeStruct((B, Dz), x.dtype),
        grid=(),
        in_specs=[_full_spec(op.shape) for op in operands],
        out_specs=_full_spec((B, Dz)),
    )(*operands)


# --------------------------------------------------------------------------- #
# Parameters: raw (PyTorch-layout) + kernel-side packing
# --------------------------------------------------------------------------- #
def init_raw_params(key, meta_dim, main_dim, z_dim, dtype=jnp.float32):
    """nn.Linear-style init: uniform +-1/sqrt(fan_in); weight layout (out, in)."""
    ks = jax.random.split(key, 12)

    def w(k, out_f, in_f):
        bound = 1.0 / math.sqrt(in_f)
        return jax.random.uniform(k, (out_f, in_f), dtype, -bound, bound)

    def b(k, out_f, in_f):
        bound = 1.0 / math.sqrt(in_f)
        return jax.random.uniform(k, (out_f,), dtype, -bound, bound)

    return {
        # AttentionLayer projections (only used when main_dim != meta_dim)
        "al_Wc": w(ks[0], main_dim, meta_dim),
        "al_Wq": w(ks[1], main_dim, main_dim),
        # GlobalAttention (attn_type='mlp')
        "ga_Wc":   w(ks[2], main_dim, main_dim),
        "ga_Wq":   w(ks[3], main_dim, main_dim),
        "ga_bq":   b(ks[4], main_dim, main_dim),
        "ga_v":    w(ks[5], 1, main_dim),
        "ga_Wout": w(ks[6], main_dim, 2 * main_dim),
        "ga_bout": b(ks[7], main_dim, 2 * main_dim),
        # LatentLayer.W_z (attention branch: in_features = main_dim)
        "Wz": w(ks[8], z_dim, main_dim),
        "bz": b(ks[9], z_dim, main_dim),
        # LatentLayer.W_z for use_attention=False (in_features = meta_dim)
        "Wz_noattn": w(ks[10], z_dim, meta_dim),
        "bz_noattn": b(ks[11], z_dim, meta_dim),
    }


def pack_params(p, meta_dim, main_dim, z_dim):
    """Pack / compose weights once (in f32) so the kernel runs 4 matmuls on 5 operands.

    - w_ctx     (meta_dim, 2*DQP): [ Wc_al^T | Wc_al^T @ Wc_ga^T ], halves 128-lane aligned
    - w_qry_aug (main_dim+1, 2*DQP): same for the query path, last row folds b_q
                                     (pairs with the ones column on main_output_t)
    - tail      (8+2*DQP+1, TL): row 0 = v, rows 8..8+DQP-1 = Woz_c, rows 8+DQP..8+2*DQP-1
                                 = Woz_q, row 8+2*DQP = b_oz   (Woz = W_out^T @ W_z^T)
    """
    f32 = jnp.float32
    Dq = main_dim
    DQP = _round_up(Dq, 128)
    TL = max(DQP, _round_up(z_dim, 128))

    if meta_dim == main_dim:
        # q_dim == k_dim branch: AttentionLayer has no outer projections.
        wc_al_t = jnp.eye(main_dim, dtype=f32)
        wq_al_t = jnp.eye(main_dim, dtype=f32)
    else:
        wc_al_t = p["al_Wc"].T.astype(f32)                    # (meta_dim, Dq)
        wq_al_t = p["al_Wq"].T.astype(f32)                    # (Dq, Dq)

    def pad_to(a, rows, cols):
        return jnp.pad(a, ((0, rows - a.shape[0]), (0, cols - a.shape[1])))

    # Context projections: one dot -> [ s | uh ], each half zero-padded to DQP lanes.
    w_ctx = jnp.concatenate(
        [pad_to(wc_al_t, wc_al_t.shape[0], DQP),
         pad_to(wc_al_t @ p["ga_Wc"].T.astype(f32), wc_al_t.shape[0], DQP)], axis=1)

    # Query projections (+ folded GA query bias):  [ main | 1 ] @ w_qry_aug = [ q | wq+b_q ].
    w_q_half  = pad_to(wq_al_t, Dq, DQP)
    w_wq_half = pad_to(wq_al_t @ p["ga_Wq"].T.astype(f32), Dq, DQP)
    bias_row = jnp.concatenate(
        [jnp.zeros((1, DQP), f32),
         pad_to(p["ga_bq"].reshape(1, -1).astype(f32), 1, DQP)], axis=1)
    w_qry_aug = jnp.concatenate(
        [jnp.concatenate([w_q_half, w_wq_half], axis=1), bias_row], axis=0)  # (Dq+1, 2*DQP)

    # Composed output head.
    w_oz = p["ga_Wout"].T.astype(f32) @ p["Wz"].T.astype(f32)               # (2*Dq, z_dim)
    b_oz = (p["ga_bout"].astype(f32) @ p["Wz"].T.astype(f32)
            + p["bz"].astype(f32)).reshape(1, -1)                           # (1, z_dim)

    tail = jnp.concatenate(
        [pad_to(p["ga_v"].reshape(1, -1).astype(f32), 8, TL),   # rows 0..7   (v in row 0)
         pad_to(w_oz[:Dq, :], DQP, TL),                         # rows 8..8+DQP-1
         pad_to(w_oz[Dq:, :], DQP, TL),                         # rows 8+DQP..8+2*DQP-1
         pad_to(b_oz, 1, TL)], axis=0)                          # row  8+2*DQP

    return {"w_ctx": w_ctx, "w_qry_aug": w_qry_aug, "tail": tail, "z_dim": z_dim}


# --------------------------------------------------------------------------- #
# Pure-JAX references (exactly mirroring the PyTorch forward, un-fused)
# --------------------------------------------------------------------------- #
def latent_layer_ref(p, meta_outputs, main_output_t, meta_dim, main_dim):
    if meta_dim == main_dim:
        s, q = meta_outputs, main_output_t
    else:
        s = meta_outputs @ p["al_Wc"].T
        q = main_output_t @ p["al_Wq"].T
    wq = q @ p["ga_Wq"].T + p["ga_bq"]
    uh = s @ p["ga_Wc"].T
    wquh = jnp.tanh(wq[:, None, :] + uh)
    align = jnp.einsum("bsd,d->bs", wquh, p["ga_v"][0])
    a = jax.nn.softmax(align, axis=-1)
    c = jnp.einsum("bs,bsd->bd", a, s)
    attn_h = jnp.concatenate([c, q], axis=-1) @ p["ga_Wout"].T + p["ga_bout"]
    return attn_h @ p["Wz"].T + p["bz"]


def latent_layer_noattn_ref(p, meta_outputs):
    x = meta_outputs[:, -1, :]
    return x @ p["Wz_noattn"].T + p["bz_noattn"]


# --------------------------------------------------------------------------- #
if __name__ == "__main__":
    B, S = 2, 8
    meta_dim, main_dim, z_dim = 16, 32, 24

    key = jax.random.PRNGKey(0)
    k_meta, k_main, k_p = jax.random.split(key, 3)
    meta_outputs = jax.random.normal(k_meta, (B, S, meta_dim), jnp.float32)
    main_output_t = jax.random.normal(k_main, (B, main_dim), jnp.float32)

    raw = init_raw_params(k_p, meta_dim, main_dim, z_dim)
    packed = pack_params(raw, meta_dim, main_dim, z_dim)

    # use_attention=True (module default) path.
    z = latent_layer_attention(meta_outputs, main_output_t, packed)
    jax.block_until_ready(z)
    z_ref = latent_layer_ref(raw, meta_outputs, main_output_t, meta_dim, main_dim)
    assert z.shape == (B, z_dim)
    # Tolerance loosened from 1e-4 to cover the EUP approximate reciprocal used for the
    # softmax normalization (everything else is f32-exact up to rounding-order changes).
    assert jnp.allclose(z, z_ref, atol=2e-3, rtol=2e-3), (
        f"attention-path mismatch: max|d|={float(jnp.max(jnp.abs(z - z_ref)))}")

    # use_attention=False path.
    packed_na = {"w": raw["Wz_noattn"].T.astype(jnp.float32),
                 "b": raw["bz_noattn"].reshape(1, -1).astype(jnp.float32)}
    z2 = latent_layer_no_attention(meta_outputs, packed_na)
    jax.block_until_ready(z2)
    z2_ref = latent_layer_noattn_ref(raw, meta_outputs)
    assert jnp.allclose(z2, z2_ref, atol=1e-4, rtol=1e-4), (
        f"no-attention-path mismatch: max|d|={float(jnp.max(jnp.abs(z2 - z2_ref)))}")

    print("KERNEL_OK")
</pallas_src>

<mosaic_0001>
module attributes {stable_mosaic.version = 11 : i64} {
  func.func @latent_attention_kernel(%arg0: memref<16x16xf32, #tpu.memory_space<vmem>>, %arg1: memref<2x33xf32, #tpu.memory_space<vmem>>, %arg2: memref<16x256xf32, #tpu.memory_space<vmem>>, %arg3: memref<33x256xf32, #tpu.memory_space<vmem>>, %arg4: memref<265x128xf32, #tpu.memory_space<vmem>>, %arg5: memref<2x24xf32, #tpu.memory_space<vmem>>) attributes {dimension_semantics = [], scalar_prefetch = 0 : i64, scratch_operands = 0 : i64, tpu.core_type = #tpu.core_type<tc>} {
    %c0 = arith.constant 0 : index
    %c0_0 = arith.constant 0 : index
    %0 = vector.load %arg0[%c0, %c0_0] : memref<16x16xf32, #tpu.memory_space<vmem>>, vector<16x16xf32>
    %c0_1 = arith.constant 0 : index
    %c0_2 = arith.constant 0 : index
    %1 = vector.load %arg2[%c0_1, %c0_2] : memref<16x256xf32, #tpu.memory_space<vmem>>, vector<16x256xf32>
    %cst = arith.constant dense<0.000000e+00> : vector<16x256xf32>
    %2 = tpu.matmul %0, %1, %cst {dimension_numbers = #tpu.dot_dimension_numbers<[1], [0], [0], [1], [0, 0, 1, 1], [], []>} : vector<16x16xf32>, vector<16x256xf32>, vector<16x256xf32> -> vector<16x256xf32>
    %3 = vector.extract_strided_slice %2 {offsets = [0, 0], sizes = [16, 128], strides = [1, 1]} : vector<16x256xf32> to vector<16x128xf32>
    %4 = vector.shape_cast %3 : vector<16x128xf32> to vector<2x8x128xf32>
    %5 = vector.extract_strided_slice %2 {offsets = [0, 128], sizes = [16, 128], strides = [1, 1]} : vector<16x256xf32> to vector<16x128xf32>
    %6 = vector.shape_cast %5 : vector<16x128xf32> to vector<2x8x128xf32>
    %c0_3 = arith.constant 0 : index
    %c0_4 = arith.constant 0 : index
    %7 = vector.load %arg1[%c0_3, %c0_4] : memref<2x33xf32, #tpu.memory_space<vmem>>, vector<2x33xf32>
    %c0_5 = arith.constant 0 : index
    %c0_6 = arith.constant 0 : index
    %8 = vector.load %arg3[%c0_5, %c0_6] : memref<33x256xf32, #tpu.memory_space<vmem>>, vector<33x256xf32>
    %cst_7 = arith.constant dense<0.000000e+00> : vector<2x256xf32>
    %9 = tpu.matmul %7, %8, %cst_7 {dimension_numbers = #tpu.dot_dimension_numbers<[1], [0], [0], [1], [0, 0, 1, 1], [], []>} : vector<2x33xf32>, vector<33x256xf32>, vector<2x256xf32> -> vector<2x256xf32>
    %10 = vector.extract_strided_slice %9 {offsets = [0, 0], sizes = [2, 128], strides = [1, 1]} : vector<2x256xf32> to vector<2x128xf32>
    %11 = vector.extract_strided_slice %9 {offsets = [0, 128], sizes = [2, 128], strides = [1, 1]} : vector<2x256xf32> to vector<2x128xf32>
    %c0_8 = arith.constant 0 : index
    %c0_9 = arith.constant 0 : index
    %12 = vector.load %arg4[%c0_8, %c0_9] : memref<265x128xf32, #tpu.memory_space<vmem>>, vector<1x128xf32>
    %13 = vector.shape_cast %12 : vector<1x128xf32> to vector<1x1x128xf32>
    %14 = vector.shape_cast %11 : vector<2x128xf32> to vector<2x1x128xf32>
    %15 = vector.broadcast %14 : vector<2x1x128xf32> to vector<2x8x128xf32>
    %16 = arith.addf %15, %6 : vector<2x8x128xf32>
    %17 = math.tanh %16 : vector<2x8x128xf32>
    %18 = vector.broadcast %13 : vector<1x1x128xf32> to vector<2x8x128xf32>
    %19 = arith.mulf %17, %18 : vector<2x8x128xf32>
    %cst_10 = arith.constant dense<0.000000e+00> : vector<2x8xf32>
    %20 = vector.multi_reduction <add>, %19, %cst_10 [2] : vector<2x8x128xf32> to vector<2x8xf32>
    %cst_11 = arith.constant dense<0xFF800000> : vector<2xf32>
    %21 = vector.multi_reduction <maximumf>, %20, %cst_11 [1] : vector<2x8xf32> to vector<2xf32>
    %22 = vector.shape_cast %21 : vector<2xf32> to vector<2x1xf32>
    %23 = vector.broadcast %22 : vector<2x1xf32> to vector<2x8xf32>
    %24 = arith.subf %20, %23 : vector<2x8xf32>
    %25 = math.exp %24 : vector<2x8xf32>
    %cst_12 = arith.constant dense<0.000000e+00> : vector<2xf32>
    %26 = vector.multi_reduction <add>, %25, %cst_12 [1] : vector<2x8xf32> to vector<2xf32>
    %27 = vector.shape_cast %26 : vector<2xf32> to vector<2x1xf32>
    %28 = vector.shape_cast %25 : vector<2x8xf32> to vector<2x8x1xf32>
    %29 = vector.broadcast %28 : vector<2x8x1xf32> to vector<2x8x128xf32>
    %30 = arith.mulf %29, %4 : vector<2x8x128xf32>
    %cst_13 = arith.constant dense<0.000000e+00> : vector<2x128xf32>
    %31 = vector.multi_reduction <add>, %30, %cst_13 [1] : vector<2x8x128xf32> to vector<2x128xf32>
    %32 = tpu.reciprocal %27 {approx = true} : vector<2x1xf32> -> vector<2x1xf32>
    %33 = vector.broadcast %32 : vector<2x1xf32> to vector<2x128xf32>
    %34 = arith.mulf %31, %33 : vector<2x128xf32>
    %c8 = arith.constant 8 : index
    %c0_14 = arith.constant 0 : index
    %35 = vector.load %arg4[%c8, %c0_14] : memref<265x128xf32, #tpu.memory_space<vmem>>, vector<128x128xf32>
    %c136 = arith.constant 136 : index
    %c0_15 = arith.constant 0 : index
    %36 = vector.load %arg4[%c136, %c0_15] : memref<265x128xf32, #tpu.memory_space<vmem>>, vector<128x128xf32>
    %c264 = arith.constant 264 : index
    %c0_16 = arith.constant 0 : index
    %37 = vector.load %arg4[%c264, %c0_16] : memref<265x128xf32, #tpu.memory_space<vmem>>, vector<1x128xf32>
    %cst_17 = arith.constant dense<0.000000e+00> : vector<2x128xf32>
    %38 = tpu.matmul %34, %35, %cst_17 {dimension_numbers = #tpu.dot_dimension_numbers<[1], [0], [0], [1], [0, 0, 1, 1], [], []>} : vector<2x128xf32>, vector<128x128xf32>, vector<2x128xf32> -> vector<2x128xf32>
    %cst_18 = arith.constant dense<0.000000e+00> : vector<2x128xf32>
    %39 = tpu.matmul %10, %36, %cst_18 {dimension_numbers = #tpu.dot_dimension_numbers<[1], [0], [0], [1], [0, 0, 1, 1], [], []>} : vector<2x128xf32>, vector<128x128xf32>, vector<2x128xf32> -> vector<2x128xf32>
    %40 = arith.addf %38, %39 : vector<2x128xf32>
    %41 = vector.broadcast %37 : vector<1x128xf32> to vector<2x128xf32>
    %42 = arith.addf %40, %41 : vector<2x128xf32>
    %43 = vector.extract_strided_slice %42 {offsets = [0, 0], sizes = [2, 24], strides = [1, 1]} : vector<2x128xf32> to vector<2x24xf32>
    %c0_19 = arith.constant 0 : index
    %c0_20 = arith.constant 0 : index
    %44 = vector.load %arg5[%c0_19, %c0_20] : memref<2x24xf32, #tpu.memory_space<vmem>>, vector<2x24xf32>
    tpu.vector_store %arg5[%c0_19, %c0_20], %43 {strides = array<i32>} : memref<2x24xf32, #tpu.memory_space<vmem>>, vector<2x24xf32>,
    return
  }
}

</mosaic_0001>

<bundles_post_ra>
// kernel: tpu_custom_call.1
= control target key start
LH: loop header
LB: loop body
LE: loop exit
PB: predicated region body
PF: predicated region fallthrough
CT: control target
= control target key end

     0   :  { %10 = vsyncpa [#allocation3], 0  ;;  %s1069_s0 = inlined_call_operand.hbm [shape: f32[16,16], index: 0, kind: input, shape index: {}]   ;;  %s1070_s1 = inlined_call_operand.vmem [shape: f32[2,33], index: 1, kind: input, shape index: {}]   ;;  %s1071_s2 = inlined_call_operand.hbm [shape: f32[16,256], index: 2, kind: input, shape index: {}]   ;;  %s1072_s3 = inlined_call_operand.hbm [shape: f32[33,256], index: 3, kind: input, shape index: {}]   ;;  %s1073_s4 = inlined_call_operand.hbm [shape: f32[265,128], index: 4, kind: input, shape index: {}]   ;;  %s1074_s5 = inlined_call_operand.hbm [shape: f32[2,24], index: 5, kind: output, shape index: {}]  }
   0x1   :  { %11 = vsyncpa [#allocation6], 0 }
   0x2   :  { %12 = vsyncpa [#allocation9], 0 }
   0x3   :  { %13 = vsyncpa [#allocation4], 0  ;;  %s904_s18 = smov [#allocation5]   ;;  %s786_s22 = scalar_lea.hbm %s1071_s2, 512 }
   0x4   :  { %s33_s19 = sshll.u32 %s904_s18, 4  ;;  %p787_p0 = scmp.ne.s32.totalorder %s1071_s2, %s786_s22  ;;  %s34_s19 = int_to_ptr.vmem [resolvable:$true] %s33_s19 }
   0x5   :  { %p790_p1 = scmp.lt.u32.totalorder %s786_s22, %s1071_s2 }
   0x7   :  { %p792_p2 = pnand %p790_p1, %p787_p0 }
   0x9   :  { %795 = shalt.err (!%p792_p2)
}
   0xa   :  { %s796_s27 = scalar_lea.vmem %s34_s19, 512  ;;  %p801_p4 = scmp.lt.s32.totalorder %s34_s19, %s34_s19 }
   0xb   :  { %p797_p3 = scmp.ne.s32.totalorder %s34_s19, %s796_s27  ;;  %p802_p5 = scmp.lt.s32.totalorder %s796_s27, %s796_s27 }
   0xd   :  { %p803_p6 = por %p802_p5, %p801_p4 }
   0xf   :  { %p804_p7 = pnand %p803_p6, %p797_p3 }
  0x11   :  { %807 = shalt.err (!%p804_p7)
}
  0x12   :  { %s905_s28 = smov 256   ;;  %s906_s29 = smov 16  }
  0x13   :  { %39 = dma.hbm_to_vmem [thread:$0]  %s1071_s2, 512, %s34_s19, [#allocation6], %s905_s28, %s905_s28, %s906_s29  }
  0x14   :  { %s907_s7 = smov [#allocation2]   ;;  %s808_s11 = scalar_lea.hbm %s1069_s0, 256 }
  0x15   :  { %s19_s8 = sshll.u32 %s907_s7, 4  ;;  %p809_p8 = scmp.ne.s32.totalorder %s1069_s0, %s808_s11  ;;  %s20_s8 = int_to_ptr.vmem [resolvable:$true] %s19_s8 }
  0x16   :  { %p812_p9 = scmp.lt.u32.totalorder %s808_s11, %s1069_s0 }
  0x18   :  { %p814_p10 = pnand %p812_p9, %p809_p8 }
  0x1a   :  { %817 = shalt.err (!%p814_p10)
}
  0x1b   :  { %s818_s16 = scalar_lea.vmem %s20_s8, 256  ;;  %p823_p12 = scmp.lt.s32.totalorder %s20_s8, %s20_s8 }
  0x1c   :  { %p819_p11 = scmp.ne.s32.totalorder %s20_s8, %s818_s16  ;;  %p824_p13 = scmp.lt.s32.totalorder %s818_s16, %s818_s16 }
  0x1e   :  { %p825_p0 = por %p824_p13, %p823_p12 }
  0x20   :  { %p826_p1 = pnand %p825_p0, %p819_p11 }
  0x22   :  { %829 = shalt.err (!%p826_p1)
}
  0x23   :  { %s908_s2 = smov 128   ;;  %s909_s17 = smov 8  }
  0x24   :  { %25 = dma.hbm_to_vmem [thread:$0]  %s1069_s0, 256, %s20_s8, [#allocation3], %s908_s2, %s908_s2, %s909_s17  }
  0x25   :  { %s910_s20 = smov [#allocation7]   ;;  %s911_s22 = smov [#allocation8]  }
  0x26   :  { %s45_s21 = sshll.u32 %s910_s20, 4  ;;  %s57_s23 = sshll.u32 %s911_s22, 4  ;;  %s46_s21 = int_to_ptr.vmem [resolvable:$true] %s45_s21  ;;  %s978_s23 = int_to_ptr.vmem [resolvable:$true] %s57_s23 }
  0x27   :  { %s830_s26 = scalar_lea.hbm %s1072_s3, 1280 }
  0x28   :  { %p831_p2 = scmp.ne.s32.totalorder %s1072_s3, %s830_s26  ;;  %p834_p3 = scmp.lt.u32.totalorder %s830_s26, %s1072_s3 }
  0x2a   :  { %p836_p4 = pnand %p834_p3, %p831_p2 }
  0x2c   :  { %839 = shalt.err (!%p836_p4)
}
  0x2d   :  { %s840_s0 = scalar_lea.vmem %s46_s21, 1280  ;;  %p845_p6 = scmp.lt.s32.totalorder %s46_s21, %s46_s21 }
  0x2e   :  { %p841_p5 = scmp.ne.s32.totalorder %s46_s21, %s840_s0  ;;  %p846_p7 = scmp.lt.s32.totalorder %s840_s0, %s840_s0 }
  0x30   :  { %p847_p8 = por %p846_p7, %p845_p6 }
  0x32   :  { %p848_p9 = pnand %p847_p8, %p841_p5 }
  0x34   :  { %851 = shalt.err (!%p848_p9)
}
  0x35   :  { %51 = dma.hbm_to_vmem [thread:$0]  %s1072_s3, 1280, %s46_s21, [#allocation6], %s905_s28, %s905_s28, %s906_s29  }
  0x36   :  { %s852_s12 = scalar_lea.hbm %s1073_s4, 4352 }
  0x37   :  { %p853_p10 = scmp.ne.s32.totalorder %s1073_s4, %s852_s12  ;;  %p856_p11 = scmp.lt.u32.totalorder %s852_s12, %s1073_s4 }
  0x39   :  { %p858_p12 = pnand %p856_p11, %p853_p10 }
  0x3b   :  { %861 = shalt.err (!%p858_p12)
}
  0x3c   :  { %s862_s18 = scalar_lea.vmem %s978_s23, 4352  ;;  %p867_p0 = scmp.lt.s32.totalorder %s978_s23, %s978_s23 }
  0x3d   :  { %p863_p13 = scmp.ne.s32.totalorder %s978_s23, %s862_s18  ;;  %p868_p1 = scmp.lt.s32.totalorder %s862_s18, %s862_s18 }
  0x3f   :  { %p869_p2 = por %p868_p1, %p867_p0 }
  0x41   :  { %p870_p3 = pnand %p869_p2, %p863_p13 }
  0x43   :  { %873 = shalt.err (!%p870_p3)
}
  0x44   :  { %63 = dma.hbm_to_vmem [thread:$0]  %s1073_s4, 4352, %s978_s23, [#allocation9], %s908_s2, %s908_s2, %s909_s17  }
  0x45   :  { %896 = dma.done.wait [#allocation3], 256  }
  0x46   :  { %897 = vsyncadd [#allocation3], 4294967040 }
  0x47   :  { %898 = dma.done.wait [#allocation6], 1792  }
  0x48   :  { %899 = vsyncadd [#allocation6], 4294965504 }
  0x49   :  { %900 = dma.done.wait [#allocation9], 4352  }
  0x4a   :  { %901 = vsyncadd [#allocation9], 4294962944  ;;  %v912_v0 = vmov 0.0   ;;  %v168_v1 = vld [vmem:[#allocation7 + $0x8] sm:$0xff]  ;;  %v170_v2 = vld [vmem:[#allocation7 + $0x18] sm:$0xff]  ;;  %vm181_vm0 = vcmask 1040384   ;;  %v264_v51 = vlaneseq }
  0x4b   :  { %252 = vmatprep.mubr.f32.mxu1 %v912_v0  ;;  %153 = vmatprep.mubr.f32.mxu0 %v912_v0  ;;  %v167_v3 = vld [vmem:[#allocation7] sm:$0xff]  ;;  %v704_v4 = vpack.c.bf16 %v170_v2, %v168_v1  ;;  %v169_v5 = vld [vmem:[#allocation7 + $0x10] sm:$0xff]  ;;  %v172_v6 = vld [vmem:[#allocation7 + $0x28] sm:$0xff]  ;;  %vm82_vm1 = vcmask 130048   ;;  %v913_v24 = vmov 0.0|0.0   ;;  %vm177_vm2 = vcmask 269312  }
  0x4c   :  { %v174_v7 = vld [vmem:[#allocation7 + $0x38] sm:$0xff]  ;;  %v706_v8 = vpack.c.bf16 %v169_v5, %v167_v3  ;;  %v171_v10 = vld [vmem:[#allocation7 + $0x20] sm:$0xff]  ;;  %v173_v11 = vld [vmem:[#allocation7 + $0x30] sm:$0xff]  ;;  %vm914_vm3 = vmmov 0   ;;  %v915_v49 = vmov 1966171168  }
  0x4d   :  { %v708_v9 = vpack.c.bf16 %v174_v7, %v172_v6  ;;  %705 = vmatprep.subr.bf16.mxu1 %v704_v4  ;;  %v79_v12 = vld [vmem:[#allocation5 + $0x8] sm:$0xff]  ;;  %v81_v13 = vld [vmem:[#allocation5 + $0x18] sm:$0xff]  ;;  %v710_v14 = vpack.c.bf16 %v173_v11, %v171_v10  ;;  %v78_v16 = vld [vmem:[#allocation5] sm:$0xff]  ;;  %v262_v50 = vunpack.c.l.s4 %v915_v49  ;;  %v265_v53 = vshrl.u32 %v264_v51, 7 }
  0x4e   :  { %707 = vmatpush1.bf16.msra.mxu1 %v706_v8  ;;  %v700_v15 = vpack.c.bf16 %v81_v13, %v79_v12  ;;  %v80_v17 = vld [vmem:[#allocation5 + $0x10] sm:$0xff]  ;;  %v403_v19 = vld [vmem:[#allocation8 + $0x88] sm:$0xff]  ;;  %v176_v20 = vld [vmem:[#allocation7 + $0x48] sm:$0x1]  ;;  %v310_v11 = vand.u32 127, %v264_v51  ;;  %vm319_vm4 = vcmask 1041409  }
  0x4f   :  { %709 = vmatprep.subr.bf16.mxu1 %v708_v9  ;;  %v702_v18 = vpack.c.bf16 %v80_v17, %v78_v16  ;;  %v404_v21 = vld [vmem:[#allocation8 + $0x90] sm:$0xff]  ;;  %v76_v22 = vld [vmem:[#allocation2] sm:$0xff]  ;;  %v405_v25 = vld [vmem:[#allocation8 + $0x98] sm:$0xff]  ;;  %v263_v52 = vunpack.c.0.s8 %v262_v50  ;;  %v285_v61 = vsub.s32 0, %v265_v53  ;;  %vm322_vm5 = vcmask 58368  }
  0x50   :  { %701 = vmatprep.subr.bf16.mxu0 %v700_v15  ;;  %v713_v23 = vpack.c.bf16 %v404_v21, %v403_v19  ;;  %v406_v26 = vld [vmem:[#allocation8 + $0xa0] sm:$0xff]  ;;  %v175_v27 = vld [vmem:[#allocation7 + $0x40] sm:$0x1]  ;;  %v77_v29 = vld [vmem:[#allocation2 + $0x8] sm:$0xff]  ;;  %v313_v13 = vsub.s32 %v310_v11, %v265_v53  ;;  %v916_v19 = vmov 0   ;;  %vm570_vm6 = vcmask 189440  }
  0x51   :  { %703 = vmatpush1.bf16.msra.mxu0 %v702_v18  ;;  %v166_v28 = vld [vmem:[%s1070_s1] sm:$0x3]  ;;  %v716_v30 = vpack.c.bf16 %v406_v26, %v405_v25  ;;  %v407_v31 = vld [vmem:[#allocation8 + $0xa8] sm:$0xff]  ;;  %v408_v32 = vld [vmem:[#allocation8 + $0xb0] sm:$0xff]  ;;  %v266_v55 = vsub.s32 %v263_v52, %v265_v53  ;;  %775 = vset.pattern.permute.xlu0 %v916_v19  ;;  %s917_s1 = smov [#allocation10]  }
  0x52   :  { %711 = vmatpush1.bf16.msra.mxu1 %v710_v14  ;;  %712 = vmatprep.subr.bf16.mxu0 %v913_v24  ;;  %v719_v33 = vpack.c.bf16 %v408_v32, %v407_v31  ;;  %v409_v34 = vld [vmem:[#allocation8 + $0xb8] sm:$0xff]  ;;  %v410_v35 = vld [vmem:[#allocation8 + $0xc0] sm:$0xff]  ;;  %v411_v37 = vld [vmem:[#allocation8 + $0xc8] sm:$0xff]  ;;  %s578_s2 = sshll.u32 %s917_s1, 4  ;;  %s579_s2 = int_to_ptr.vmem [resolvable:$true] %s578_s2 }
  0x53   :  { %591 = vmatprep.subr.msk.mxu1 %vm181_vm0, %v176_v20  ;;  %v722_v36 = vpack.c.bf16 %v410_v35, %v409_v34  ;;  %v412_v38 = vld [vmem:[#allocation8 + $0xd0] sm:$0xff]  ;;  %v413_v40 = vld [vmem:[#allocation8 + $0xd8] sm:$0xff]  ;;  %v414_v41 = vld [vmem:[#allocation8 + $0xe0] sm:$0xff]  ;;  %774 = vset.pattern.permute.xlu1 %v916_v19  ;;  %s874_s17 = scalar_lea.vmem %s579_s2, 32  ;;  %p879_p5 = scmp.lt.s32.totalorder %s579_s2, %s579_s2 }
  0x54   :  { %589 = vmatmul.mubr.msk.f32.vlgmr.msra.gmra.mrb[0].mxu0 %vm82_vm1, %v76_v22  ;;  %v725_v39 = vpack.c.bf16 %v412_v38, %v411_v37  ;;  %v728_v42 = vpack.c.bf16 %v414_v41, %v413_v40  ;;  %v415_v43 = vld [vmem:[#allocation8 + $0xe8] sm:$0xff]  ;;  %v416_v44 = vld [vmem:[#allocation8 + $0xf0] sm:$0xff]  ;;  %v417_v46 = vld [vmem:[#allocation8 + $0xf8] sm:$0xff]  ;;  %v333_v22 = vsub.s32 1, %v265_v53  ;;  %p875_p4 = scmp.ne.s32.totalorder %s579_s2, %s874_s17  ;;  %p880_p6 = scmp.lt.s32.totalorder %s874_s17, %s874_s17 }
  0x55   :  { %159 = vmatprep.mubr.f32.mxu0 %v912_v0  ;;  %714 = vmatpush3.bf16.msra.mxu0 %v713_v23  ;;  %v731_v45 = vpack.c.bf16 %v416_v44, %v415_v43  ;;  %v418_v47 = vld [vmem:[#allocation8 + $0x100] sm:$0xff]  ;;  %v388_v34 = vld [vmem:[#allocation8 + $0x10] sm:$0xff]  ;;  %v389_v35 = vld [vmem:[#allocation8 + $0x18] sm:$0xff] }
  0x56   :  { %592 = vmatpush1.msk.msra.mxu1 %vm181_vm0, %v175_v27  ;;  %715 = vmatprep.subr.bf16.mxu0 %v913_v24  ;;  %v734_v48 = vpack.c.bf16 %v418_v47, %v417_v46  ;;  %v594_v6 = vld [vmem:[#allocation8] ss:$0 sm:$0xff]  ;;  %v392_v40 = vld [vmem:[#allocation8 + $0x30] sm:$0xff]  ;;  %v395_v52 = vld [vmem:[#allocation8 + $0x48] sm:$0xff]  ;;  %p881_p7 = por %p880_p6, %p879_p5 }
  0x57   :  { %593 = vmatmul.mubr.msk.f32.vlgmr.msra.gmra.mrb[0].mxu1 %vm177_vm2, %v166_v28  ;;  %736 = vmatprep.subr.bf16.mxu1 %v913_v24  ;;  %v390_v37 = vld [vmem:[#allocation8 + $0x20] sm:$0xff]  ;;  %v396_v53 = vld [vmem:[#allocation8 + $0x50] sm:$0xff]  ;;  %v595_v19 = vld [vmem:[#allocation8 + $0x108] ss:$0 sm:$0xff] }
  0x58   :  { %590 = vmatmul.mubr.msk.f32.gmra.mrb[2].mxu0 %vm82_vm1, %v77_v29  ;;  %697 = vmatprep.mubr.msk.f32.mxu1 %vm914_vm3, %v912_v0  ;;  %v740_v38 = vpack.c.bf16 %v390_v37, %v389_v35  ;;  %v394_v43 = vld [vmem:[#allocation8 + $0x40] sm:$0xff]  ;;  %p882_p8 = pnand %p881_p7, %p875_p4 }
  0x59   :  { %717 = vmatpush3.bf16.msra.mxu0 %v716_v30  ;;  %662 = vmatprep.mubr.msk.f32.mxu0 %vm914_vm3, %v912_v0 }
  0x5a   :  { %718 = vmatprep.subr.bf16.mxu0 %v913_v24 }
  0x5d   :  { %720 = vmatpush3.bf16.msra.mxu0 %v719_v33  ;;  %v387_v33 = vld [vmem:[#allocation8 + $0x8] sm:$0xff] }
  0x5e   :  { %721 = vmatprep.subr.bf16.mxu0 %v913_v24 }
  0x61   :  { %723 = vmatpush3.bf16.msra.mxu0 %v722_v36  ;;  %v737_v36 = vpack.c.bf16 %v388_v34, %v387_v33 }
  0x62   :  { %724 = vmatprep.subr.bf16.mxu0 %v913_v24 }
  0x63   :  { %738 = vmatpush3.bf16.msra.mxu1 %v737_v36 }
  0x64   :  { %739 = vmatprep.subr.bf16.mxu1 %v913_v24 }
  0x65   :  { %726 = vmatpush3.bf16.msra.mxu0 %v725_v39  ;;  %v391_v39 = vld [vmem:[#allocation8 + $0x28] sm:$0xff] }
  0x66   :  { %727 = vmatprep.subr.bf16.mxu0 %v913_v24  ;;  %v743_v41 = vpack.c.bf16 %v392_v40, %v391_v39 }
  0x67   :  { %741 = vmatpush3.bf16.msra.mxu1 %v740_v38 }
  0x68   :  { %742 = vmatprep.subr.bf16.mxu1 %v913_v24 }
  0x69   :  { %729 = vmatpush3.bf16.msra.mxu0 %v728_v42  ;;  %v393_v42 = vld [vmem:[#allocation8 + $0x38] sm:$0xff] }
  0x6a   :  { %730 = vmatprep.subr.bf16.mxu0 %v913_v24  ;;  %v746_v44 = vpack.c.bf16 %v394_v43, %v393_v42 }
  0x6b   :  { %744 = vmatpush3.bf16.msra.mxu1 %v743_v41 }
  0x6c   :  { %745 = vmatprep.subr.bf16.mxu1 %v913_v24 }
  0x6d   :  { %732 = vmatpush3.bf16.msra.mxu0 %v731_v45 }
  0x6e   :  { %733 = vmatprep.subr.bf16.mxu0 %v913_v24 }
  0x6f   :  { %747 = vmatpush3.bf16.msra.mxu1 %v746_v44 }
  0x70   :  { %748 = vmatprep.subr.bf16.mxu1 %v913_v24 }
  0x71   :  { %735 = vmatpush3.bf16.msra.mxu0 %v734_v48 }
 0x127   :  { %v1036_v54 = vpop.f32.mrb[0].mxu0 }
 0x128   :  { %v157_v56 = vpop.f32.mrb[1].mxu0 }
 0x12a   :  { %v254_v57 = vpop.f32.mrb[0].mxu1 }
 0x12b   :  { %v256_v58 = vpop.f32.mrb[1].mxu1  ;;  %663 = vmatmul.mubr.f32.vlgmr.msra.gmra.mrb[4].mxu0 %v254_v57  ;;  %v1038_v59 = vpop.f32.mrb[2].mxu0  ;;  %v398_v57 = vld [vmem:[#allocation8 + $0x60] sm:$0xff] }
 0x12c   :  { %v267_v60 = vrot.slane %v256_v58, %v266_v55  ;;  %v163_v62 = vpop.f32.mrb[3].mxu0 }
 0x12e   :  { %v268_v63 = vcombine.high %v267_v60, %v267_v60  ;;  %v275_v1 = vrot.slane %v267_v60, %v266_v55  ;;  %v399_v60 = vld [vmem:[#allocation8 + $0x68] sm:$0xff] }
 0x130   :  { %v286_v0 = vrot.slane %v275_v1, %v285_v61  ;;  %v282_v2 = vrot.slane %v268_v63, %v266_v55  ;;  %v397_v55 = vld [vmem:[#allocation8 + $0x58] sm:$0xff]  ;;  %v402_v63 = vld [vmem:[#allocation8 + $0x80] sm:$0xff] }
 0x131   :  { %v752_v58 = vpack.c.bf16 %v398_v57, %v397_v55 }
 0x132   :  { %v293_v3 = vadd.f32 %v286_v0, %v157_v56  ;;  %v290_v4 = vrot.slane %v282_v2, %v285_v61  ;;  %v749_v56 = vpack.c.bf16 %v396_v53, %v395_v52 }
 0x134   :  { %776 = vtanh.f32 %v293_v3  ;;  %v294_v5 = vadd.f32 %v290_v4, %v163_v62  ;;  %750 = vmatpush3.bf16.msra.mxu1 %v749_v56 }
 0x135   :  { %751 = vmatprep.subr.bf16.mxu1 %v913_v24 }
 0x136   :  { %778 = vtanh.f32 %v294_v5 }
 0x138   :  { %753 = vmatpush3.bf16.msra.mxu1 %v752_v58 }
 0x139   :  { %754 = vmatprep.subr.bf16.mxu1 %v913_v24 }
 0x13e   :  { %v777_v7 = vpop.eup %776 }
 0x13f   :  { %v301_v8 = vmul.f32 %v777_v7, %v594_v6 }
 0x140   :  { %v779_v9 = vpop.eup %778 }
 0x141   :  { %303 = vadd.xlane.f32.xlu0 %v301_v8  ;;  %v302_v10 = vmul.f32 %v779_v9, %v594_v6 }
 0x145   :  { %305 = vadd.xlane.f32.xlu0 %v302_v10 }
 0x1ce   :  { %v304_v12 = vpop.xlane.xlu0 %303 }
 0x1cf   :  { %v314_v15 = vrot.slane %v304_v12, %v313_v13 }
 0x1d2   :  { %v306_v14 = vpop.xlane.xlu0 %305 }
 0x1d3   :  { %v318_v16 = vrot.slane %v306_v14, %v313_v13 }
 0x1d5   :  { %v320_v17 = vsel %vm319_vm4, %v318_v16, %v314_v15 }
 0x1d6   :  { %v323_v18 = vsel %vm322_vm5, %v320_v17, -inf }
 0x1d7   :  { %324 = vmax.xlane.f32.xlu1 %v323_v18 }
 0x1fe   :  { %v1042_v20 = vpop.f32.mrb[4].mxu0 }
 0x1ff   :  { %v664_v21 = vpop.f32.mrb[5].mxu0 }
 0x264   :  { %v325_v23 = vpop.xlane.xlu1 %324 }
 0x265   :  { %v330_v25 = vrot.slane %v325_v23, %v285_v61  ;;  %v334_v26 = vrot.slane %v325_v23, %v333_v22  ;;  %v400_v61 = vld [vmem:[#allocation8 + $0x70] sm:$0xff] }
 0x266   :  { %v755_v62 = vpack.c.bf16 %v400_v61, %v399_v60 }
 0x267   :  { %v337_v27 = vsub.f32 %v304_v12, %v330_v25  ;;  %v338_v28 = vsub.f32 %v306_v14, %v334_v26 }
 0x268   :  { %756 = vmatpush3.bf16.msra.mxu1 %v755_v62 }
 0x269   :  { %v339_v29 = vmul.f32 1.442695, %v337_v27  ;;  %v341_v30 = vmul.f32 1.442695, %v338_v28  ;;  %757 = vmatprep.subr.bf16.mxu1 %v913_v24 }
 0x26b   :  { %780 = vpow2.f32 %v339_v29 }
 0x26c   :  { %782 = vpow2.f32 %v341_v30 }
 0x275   :  { %v781_v31 = vpop.eup %780 }
 0x276   :  { %v783_v32 = vpop.eup %782  ;;  %346 = vperm.xlu1 %774, %v781_v31  }
 0x277   :  { %349 = vperm.xlu0 %775, %v783_v32  }
 0x2f5   :  { %v347_v45 = vpop.permute.xlu1 %346 }
 0x2f6   :  { %v350_v46 = vpop.permute.xlu0 %349  ;;  %v354_v47 = vrot.slane %v347_v45, %v313_v13  ;;  %v366_v0 = vmul.f32 %v347_v45, %v1036_v54 }
 0x2f7   :  { %v358_v48 = vrot.slane %v350_v46, %v313_v13  ;;  %v367_v49 = vmul.f32 %v350_v46, %v1038_v59  ;;  %v401_v59 = vld [vmem:[#allocation8 + $0x78] sm:$0xff] }
 0x2f8   :  { %v758_v1 = vpack.c.bf16 %v402_v63, %v401_v59  ;;  %v368_v3 = vrot.slane %v366_v0, 4 }
 0x2f9   :  { %v359_v50 = vsel %vm319_vm4, %v358_v48, %v354_v47  ;;  %v374_v2 = vrot.slane %v367_v49, 4 }
 0x2fa   :  { %v361_v51 = vsel %vm322_vm5, %v359_v50, 0.0  ;;  %759 = vmatpush3.bf16.msra.mxu1 %v758_v1  ;;  %v369_v5 = vadd.f32 %v368_v3, %v366_v0 }
 0x2fb   :  { %362 = vadd.xlane.f32.xlu1 %v361_v51  ;;  %v375_v4 = vadd.f32 %v374_v2, %v367_v49 }
 0x2fc   :  { %v370_v8 = vrot.slane %v369_v5, 2 }
 0x2fd   :  { %v376_v6 = vrot.slane %v375_v4, 2 }
 0x2fe   :  { %v371_v10 = vadd.f32 %v370_v8, %v369_v5 }
 0x2ff   :  { %v377_v9 = vadd.f32 %v376_v6, %v375_v4 }
 0x300   :  { %v372_v12 = vrot.slane %v371_v10, 1 }
 0x301   :  { %v378_v11 = vrot.slane %v377_v9, 1 }
 0x302   :  { %v373_v16 = vadd.f32 %v372_v12, %v371_v10 }
 0x303   :  { %v379_v14 = vadd.f32 %v378_v11, %v377_v9 }
 0x388   :  { %v363_v7 = vpop.xlane.xlu1 %362 }
 0x389   :  { %784 = vrcp.f32 %v363_v7 }
 0x393   :  { %v785_v13 = vpop.eup %784 }
 0x394   :  { %v382_v15 = vrot.slane %v785_v13, 1  ;;  %v385_v17 = vmul.f32 %v785_v13, %v373_v16 }
 0x396   :  { %v386_v24 = vmul.f32 %v382_v15, %v379_v14 }
 0x398   :  { %v492_v18 = vrot.slane %v386_v24, 7 }
 0x39a   :  { %v493_v54 = vsel %vm319_vm4, %v492_v18, %v385_v17 }
 0x39b   :  { %698 = vmatmul.mubr.f32.vlgmr.msra.gmra.mrb[2].mxu1 %v493_v54 }
 0x46e   :  { %v561_v21 = vpop.f32.mrb[2].mxu1 }
 0x46f   :  { %v562_v22 = vadd.f32 %v561_v21, %v1042_v20  ;;  %v699_v23 = vpop.f32.mrb[3].mxu1 }
 0x471   :  { %v569_v25 = vadd.f32 %v595_v19, %v562_v22 }
 0x473   :  { %571 = vst.msk [vmem:[#allocation10] sm:$0x3] %vm570_vm6, %v569_v25 }
 0x474   :  { %885 = shalt.err (!%p882_p8)
}
 0x475   :  { %s886_s21 = scalar_lea.hbm %s1074_s5, 32 }
 0x476   :  { %p887_p9 = scmp.ne.s32.totalorder %s1074_s5, %s886_s21  ;;  %p890_p10 = scmp.lt.u32.totalorder %s886_s21, %s1074_s5 }
 0x478   :  { %p892_p11 = pnand %p890_p10, %p887_p9 }
 0x47a   :  { %895 = shalt.err (!%p892_p11)
}
 0x47b   :  { %581 = dma.vmem_to_hbm [thread:$0]  %s579_s2, 32, %s1074_s5, [#allocation4]  }
 0x47c   :  { %902 = dma.done.wait [#allocation4], 32  }
 0x47d   :  { %903 = vsyncadd [#allocation4], 4294967264 }
 0x47e   :  { %585 = vsyncpa [#allocation3], 1 }
 0x47f   :  { %586 = vsyncpa [#allocation6], 1 }
 0x480   :  { %587 = vsyncpa [#allocation9], 1 }
 0x481   :  { %588 = vsyncpa [#allocation4], 1 }

</bundles_post_ra>
